<compile_context>
chip_gen: v7x
topology: tpu7x:2x2x1
jax: 0.10.0
libtpu: 0.0.40
codegen_flags: <defaults>
</compile_context>

<pallas_src>
import math

import jax
import jax.numpy as jnp
from jax.experimental import pallas as pl
from jax.experimental.pallas import tpu as pltpu

BN_EPS = 1e-5
_LANE = 128


def _chunked_partials(v, fns):
    """Lane-dense partial reduction of v ([C, T] with T % 128 == 0).

    Sums static 128-lane chunks with pure VPU adds (no XLU cross-lane reduce).
    `fns` is a tuple of elementwise maps applied to each (f32) chunk; returns
    one [C, 128] float32 partial sum per fn.
    """
    _, t = v.shape
    accs = [None] * len(fns)
    for i in range(t // _LANE):
        c = v[:, i * _LANE:(i + 1) * _LANE].astype(jnp.float32)
        for j, fn in enumerate(fns):
            term = fn(c)
            accs[j] = term if accs[j] is None else accs[j] + term
    return accs


def _stats_gram_kernel(x_ref, xsum_ref, gram_ref):
    # x_ref:    [1, Cin, T]    pixel tile of one batch element
    # xsum_ref: [1, Cin, 128]  per-batch lane-dense partial sum of x
    # gram_ref: [1, Cin, Cin]  per-batch partial Gram matrix sum_p x x^T
    @pl.when(pl.program_id(1) == 0)
    def _init():
        xsum_ref[...] = jnp.zeros_like(xsum_ref)
        gram_ref[...] = jnp.zeros_like(gram_ref)

    x = x_ref[0]                                       # [Cin, T], native dtype
    (s,) = _chunked_partials(x, (lambda c: c,))
    xsum_ref[0] += s
    # x @ x^T on the MXU in the native dtype, f32 accumulation (no upcast).
    gram_ref[0] += jax.lax.dot_general(
        x, x, (((1,), (1,)), ((), ())), preferred_element_type=jnp.float32)


def _stats_direct_kernel(x_ref, w_ref, ysum_ref, ysq_ref):
    # x_ref: [1, Cin, T]; w_ref: [Cout, Cin] (resident)
    # ysum_ref / ysq_ref: [1, Cout, 128] per-batch lane-dense partials of y, y^2
    @pl.when(pl.program_id(1) == 0)
    def _init():
        ysum_ref[...] = jnp.zeros_like(ysum_ref)
        ysq_ref[...] = jnp.zeros_like(ysq_ref)

    # Native-dtype operands on the MXU, f32 accumulation.
    y = jnp.dot(w_ref[...], x_ref[0], preferred_element_type=jnp.float32)
    s, q = _chunked_partials(y, (lambda c: c, lambda c: c * c))
    ysum_ref[0] += s
    ysq_ref[0] += q


def _apply_kernel(x_ref, w_ref, scale_ref, shift_ref, o_ref):
    # x_ref: [1, Cin, T]; w_ref: [Cout, Cin]; scale/shift: [Cout, 1] f32
    # o_ref: [1, Cout, T]  (lane-dense output stream)
    y = jnp.dot(w_ref[...], x_ref[0], preferred_element_type=jnp.float32)
    out = y * scale_ref[...] + shift_ref[...]                 # folded BN
    o_ref[0] = jnp.maximum(out, 0.0).astype(o_ref.dtype)      # ReLU


def _vmem_budget():
    """(tile_set_budget_bytes, vmem_limit_bytes) derived from this chip's VMEM."""
    cap = 64 << 20                       # conservative default = v7x per-core VMEM
    try:
        info = pltpu.get_tpu_info()
        cap = int(getattr(info, "vmem_capacity_bytes", cap))
    except Exception:
        pass
    tile_budget = max(cap // 4, 8 << 20)                     # double-buffered tile set
    vmem_limit = max(min(3 * cap // 4, cap - (8 << 20)), 16 << 20)
    return int(tile_budget), int(vmem_limit)


def _round_up(x, m):
    return (x + m - 1) // m * m


def _pick_hw_tiling(hw, max_tile_elems):
    """Return (T, HW_pad): lane-tile width (multiple of 128) and padded HW."""
    hw128 = _round_up(hw, _LANE)
    cap = max(_LANE, min((max_tile_elems // _LANE) * _LANE, hw128))
    t = cap
    while t >= _LANE:                    # largest multiple-of-128 divisor <= cap
        if hw128 % t == 0:
            break
        t -= _LANE
    if t >= cap // 2:
        return t, hw128
    # Awkward HW factorisation: pad further so the pipeline keeps big steps.
    return cap, _round_up(hw, cap)


def transfer_conv(x_nchw, weight, gamma, beta, *, bn_eps=BN_EPS):
    """x_nchw: [N, Cin, H, W]; weight: [Cout, Cin] (1x1 kernel squeezed);
    gamma/beta: [Cout]. Conv1x1(no bias) -> BN(train batch stats) -> ReLU."""
    N, Cin, H, W = x_nchw.shape
    Cout = weight.shape[0]
    HW = H * W
    M = N * HW                                    # true pixel count for BN stats

    in_item = jnp.dtype(x_nchw.dtype).itemsize
    tile_budget, vmem_limit = _vmem_budget()
    # Per-pixel VMEM cost: double-buffered x/out tiles + f32 y intermediate.
    per_pixel = 2 * (Cin + Cout) * in_item + 4 * Cout
    resident = 2 * Cout * Cin * in_item + (64 << 10)
    max_tile_elems = max(_LANE, max(tile_budget - resident, 0) // per_pixel)
    max_tile_elems = min(max_tile_elems, 32768)   # keep chunk-unroll bounded
    T, HW_pad = _pick_hw_tiling(HW, max_tile_elems)
    n_tiles = HW_pad // T

    x3 = x_nchw.reshape(N, Cin, HW)
    if HW_pad != HW:
        # Zero padding contributes exactly 0 to every accumulated statistic.
        x3 = jnp.pad(x3, ((0, 0), (0, 0), (0, HW_pad - HW)))
    # Keep MXU operands in the input dtype (bf16 x -> bf16 W, headline MXU rate).
    w2 = weight.reshape(Cout, Cin).astype(x_nchw.dtype)
    # TODO(synk): pad Cin to the sublane packing (8 f32 / 16 bf16) when it is
    # not already a multiple; small Cin under-fills the MXU (HBM-bound regime).

    compiler_stats = pltpu.CompilerParams(
        dimension_semantics=("parallel", "arbitrary"),
        vmem_limit_bytes=vmem_limit)
    compiler_apply = pltpu.CompilerParams(
        dimension_semantics=("parallel", "parallel"),
        vmem_limit_bytes=vmem_limit)

    x_spec = pl.BlockSpec((1, Cin, T), lambda n, t: (n, 0, t))
    w_spec = pl.BlockSpec((Cout, Cin), lambda n, t: (0, 0))

    if Cout >= Cin:
        # Gram-matrix statistics: pass 1 only streams x.
        xsum_p, gram_p = pl.pallas_call(
            _stats_gram_kernel,
            grid=(N, n_tiles),
            in_specs=[x_spec],
            out_specs=(
                pl.BlockSpec((1, Cin, _LANE), lambda n, t: (n, 0, 0)),
                pl.BlockSpec((1, Cin, Cin), lambda n, t: (n, 0, 0)),
            ),
            out_shape=(
                jax.ShapeDtypeStruct((N, Cin, _LANE), jnp.float32),
                jax.ShapeDtypeStruct((N, Cin, Cin), jnp.float32),
            ),
            compiler_params=compiler_stats,
            cost_estimate=pl.CostEstimate(
                flops=int(2 * N * HW_pad * Cin * Cin + N * HW_pad * Cin),
                transcendentals=0,
                bytes_accessed=int(N * HW_pad * Cin * in_item)),
        )(x3)
        wf = w2.astype(jnp.float32)
        s = jnp.sum(xsum_p, axis=(0, 2))               # [Cin]
        g = jnp.sum(gram_p, axis=0)                    # [Cin, Cin]
        sum_y = wf @ s                                 # [Cout]
        sumsq_y = jnp.sum((wf @ g) * wf, axis=1)       # [Cout]
    else:
        # Direct statistics on y = W @ x (Cout < Cin: y is the cheaper stream).
        ysum_p, ysq_p = pl.pallas_call(
            _stats_direct_kernel,
            grid=(N, n_tiles),
            in_specs=[x_spec, w_spec],
            out_specs=(
                pl.BlockSpec((1, Cout, _LANE), lambda n, t: (n, 0, 0)),
                pl.BlockSpec((1, Cout, _LANE), lambda n, t: (n, 0, 0)),
            ),
            out_shape=(
                jax.ShapeDtypeStruct((N, Cout, _LANE), jnp.float32),
                jax.ShapeDtypeStruct((N, Cout, _LANE), jnp.float32),
            ),
            compiler_params=compiler_stats,
            cost_estimate=pl.CostEstimate(
                flops=int(2 * N * HW_pad * Cin * Cout + 3 * N * HW_pad * Cout),
                transcendentals=0,
                bytes_accessed=int(N * HW_pad * Cin * in_item)),
        )(x3, w2)
        sum_y = jnp.sum(ysum_p, axis=(0, 2))           # [Cout]
        sumsq_y = jnp.sum(ysq_p, axis=(0, 2))          # [Cout]

    # Tiny Cout-sized epilogue in plain JAX (f32): fold batch stats + affine.
    # TODO(synk): E[y^2]-mean^2 in f32 can cancel when |mean| >> std and M is
    # huge; Kahan-compensated accumulation would harden this further.
    mean = sum_y / jnp.float32(M)
    var = jnp.maximum(sumsq_y / jnp.float32(M) - mean * mean, 0.0)  # biased var
    inv_std = jax.lax.rsqrt(var + jnp.float32(bn_eps))
    gamma_f = gamma.astype(jnp.float32)
    beta_f = beta.astype(jnp.float32)
    scale = (gamma_f * inv_std).reshape(Cout, 1)
    shift = (beta_f - mean * gamma_f * inv_std).reshape(Cout, 1)

    # Pass 2: (re)compute the 1x1 conv tile-by-tile (x is only Cin wide) and
    # apply folded BN + ReLU with a lane-dense output stream.
    # TODO(synk): for large Cin*Cout (MXU-bound, >=512x512) add a Cout grid
    # axis so W and the output tile are tiled instead of fully resident.
    out3 = pl.pallas_call(
        _apply_kernel,
        grid=(N, n_tiles),
        in_specs=[
            x_spec,
            w_spec,
            pl.BlockSpec((Cout, 1), lambda n, t: (0, 0)),   # scale (resident)
            pl.BlockSpec((Cout, 1), lambda n, t: (0, 0)),   # shift (resident)
        ],
        out_specs=pl.BlockSpec((1, Cout, T), lambda n, t: (n, 0, t)),
        out_shape=jax.ShapeDtypeStruct((N, Cout, HW_pad), x_nchw.dtype),
        compiler_params=compiler_apply,
        cost_estimate=pl.CostEstimate(
            flops=int(2 * N * HW_pad * Cin * Cout + 2 * N * HW_pad * Cout),
            transcendentals=0,
            bytes_accessed=int(N * HW_pad * (Cin + Cout) * in_item)),
    )(x3, w2, scale, shift)

    if HW_pad != HW:
        out3 = out3[:, :, :HW]
    return out3.reshape(N, Cout, H, W)


def init_params(key, in_feature, out_feature):
    # Conv2d(in, out, k=1, bias=False): weight ~ N(0, sqrt(2 / (1*1*out)))
    n = 1 * 1 * out_feature
    std = math.sqrt(2.0 / n)
    weight = std * jax.random.normal(key, (out_feature, in_feature), dtype=jnp.float32)
    # BatchNorm2d: weight (gamma) = 1, bias (beta) = 0
    gamma = jnp.ones((out_feature,), dtype=jnp.float32)
    beta = jnp.zeros((out_feature,), dtype=jnp.float32)
    return weight, gamma, beta


def _reference(x_nchw, weight, gamma, beta):
    # Pure-JAX reference of Conv1x1 -> BN(train, biased var) -> ReLU.
    y = jnp.einsum("nchw,oc->nohw", x_nchw, weight)
    mean = jnp.mean(y, axis=(0, 2, 3), keepdims=True)
    var = jnp.mean((y - mean) ** 2, axis=(0, 2, 3), keepdims=True)
    yhat = (y - mean) * jax.lax.rsqrt(var + BN_EPS)
    yhat = yhat * gamma.reshape(1, -1, 1, 1) + beta.reshape(1, -1, 1, 1)
    return jnp.maximum(yhat, 0.0)


if __name__ == "__main__":
    key = jax.random.PRNGKey(0)
    k1, k2, k3, k4 = jax.random.split(key, 4)

    # Case 1: Cout >= Cin -> Gram-statistics pass 1 (HW already lane-aligned).
    N, Cin, H, W = 2, 4, 16, 16
    Cout = 8
    x = jax.random.normal(k1, (N, Cin, H, W), dtype=jnp.float32)
    weight, gamma, beta = init_params(k2, Cin, Cout)
    out = jax.block_until_ready(transfer_conv(x, weight, gamma, beta))
    ref = _reference(x, weight, gamma, beta)
    assert out.shape == (N, Cout, H, W)
    assert jnp.allclose(out, ref, atol=1e-4, rtol=1e-4)

    # Case 2: Cout < Cin -> direct-statistics pass 1, plus ragged-HW padding.
    N2, Cin2, H2, W2, Cout2 = 2, 8, 12, 12, 4
    x2 = jax.random.normal(k3, (N2, Cin2, H2, W2), dtype=jnp.float32)
    weight2, gamma2, beta2 = init_params(k4, Cin2, Cout2)
    out2 = jax.block_until_ready(transfer_conv(x2, weight2, gamma2, beta2))
    ref2 = _reference(x2, weight2, gamma2, beta2)
    assert out2.shape == (N2, Cout2, H2, W2)
    assert jnp.allclose(out2, ref2, atol=1e-4, rtol=1e-4)

    print("KERNEL_OK")
</pallas_src>

<mosaic_0001>
module attributes {stable_mosaic.version = 11 : i64} {
  func.func @_stats_gram_kernel(%arg0: i32, %arg1: i32, %arg2: memref<1x4x256xf32, #tpu.memory_space<vmem>>, %arg3: memref<1x4x128xf32, #tpu.memory_space<vmem>>, %arg4: memref<1x4x4xf32, #tpu.memory_space<vmem>>) attributes {dimension_semantics = [#tpu.dimension_semantics<parallel>, #tpu.dimension_semantics<arbitrary>], iteration_bounds = array<i64: 2, 1>, scalar_prefetch = 0 : i64, scratch_operands = 0 : i64, tpu.core_type = #tpu.core_type<tc>, window_params = [{transform_indices = @transform_0, window_bounds = array<i64: 1, 4, 256>}, {transform_indices = @transform_1, window_bounds = array<i64: 1, 4, 128>}, {transform_indices = @transform_2, window_bounds = array<i64: 1, 4, 4>}]} {
    %c0_i32 = arith.constant 0 : i32
    %0 = arith.cmpi eq, %arg1, %c0_i32 : i32
    %1 = arith.extui %0 : i1 to i32
    %c0_i32_0 = arith.constant 0 : i32
    %2 = arith.cmpi ne, %1, %c0_i32_0 : i32
    scf.if %2 {
      %cst_15 = arith.constant 0.000000e+00 : f32
      %21 = vector.broadcast %cst_15 : f32 to vector<1x4x128xf32>
      %c0_16 = arith.constant 0 : index
      %c0_17 = arith.constant 0 : index
      %c0_18 = arith.constant 0 : index
      %22 = vector.load %arg3[%c0_16, %c0_17, %c0_18] : memref<1x4x128xf32, #tpu.memory_space<vmem>>, vector<1x4x128xf32>
      tpu.vector_store %arg3[%c0_16, %c0_17, %c0_18], %21 {strides = array<i32>} : memref<1x4x128xf32, #tpu.memory_space<vmem>>, vector<1x4x128xf32>,
      %cst_19 = arith.constant 0.000000e+00 : f32
      %23 = vector.broadcast %cst_19 : f32 to vector<1x4x4xf32>
      %c0_20 = arith.constant 0 : index
      %c0_21 = arith.constant 0 : index
      %c0_22 = arith.constant 0 : index
      %24 = vector.load %arg4[%c0_20, %c0_21, %c0_22] : memref<1x4x4xf32, #tpu.memory_space<vmem>>, vector<1x4x4xf32>
      tpu.vector_store %arg4[%c0_20, %c0_21, %c0_22], %23 {strides = array<i32>} : memref<1x4x4xf32, #tpu.memory_space<vmem>>, vector<1x4x4xf32>,
    } else {
    }
    %c0 = arith.constant 0 : index
    %c0_1 = arith.constant 0 : index
    %c0_2 = arith.constant 0 : index
    %3 = vector.load %arg2[%c0, %c0_1, %c0_2] : memref<1x4x256xf32, #tpu.memory_space<vmem>>, vector<1x4x256xf32>
    %4 = vector.shape_cast %3 : vector<1x4x256xf32> to vector<4x256xf32>
    %5 = vector.extract_strided_slice %4 {offsets = [0, 0], sizes = [4, 128], strides = [1, 1]} : vector<4x256xf32> to vector<4x128xf32>
    %6 = vector.extract_strided_slice %4 {offsets = [0, 128], sizes = [4, 128], strides = [1, 1]} : vector<4x256xf32> to vector<4x128xf32>
    %7 = arith.addf %5, %6 : vector<4x128xf32>
    %c0_3 = arith.constant 0 : index
    %c0_4 = arith.constant 0 : index
    %c0_5 = arith.constant 0 : index
    %8 = vector.load %arg3[%c0_3, %c0_4, %c0_5] : memref<1x4x128xf32, #tpu.memory_space<vmem>>, vector<1x4x128xf32>
    %9 = vector.shape_cast %8 : vector<1x4x128xf32> to vector<4x128xf32>
    %10 = arith.addf %9, %7 : vector<4x128xf32>
    %c0_6 = arith.constant 0 : index
    %c0_7 = arith.constant 0 : index
    %c0_8 = arith.constant 0 : index
    %11 = vector.load %arg3[%c0_6, %c0_7, %c0_8] : memref<1x4x128xf32, #tpu.memory_space<vmem>>, vector<1x4x128xf32>
    %12 = vector.shape_cast %11 : vector<1x4x128xf32> to vector<4x128xf32>
    %13 = vector.shape_cast %10 : vector<4x128xf32> to vector<1x4x128xf32>
    tpu.vector_store %arg3[%c0_6, %c0_7, %c0_8], %13 {strides = array<i32>} : memref<1x4x128xf32, #tpu.memory_space<vmem>>, vector<1x4x128xf32>,
    %c0_9 = arith.constant 0 : index
    %c0_10 = arith.constant 0 : index
    %c0_11 = arith.constant 0 : index
    %14 = vector.load %arg4[%c0_9, %c0_10, %c0_11] : memref<1x4x4xf32, #tpu.memory_space<vmem>>, vector<1x4x4xf32>
    %15 = vector.shape_cast %14 : vector<1x4x4xf32> to vector<4x4xf32>
    %cst = arith.constant dense<0.000000e+00> : vector<4x4xf32>
    %16 = tpu.matmul %4, %4, %cst {dimension_numbers = #tpu.dot_dimension_numbers<[1], [1], [0], [0], [0, 0, 1, 0], [], []>} : vector<4x256xf32>, vector<4x256xf32>, vector<4x4xf32> -> vector<4x4xf32>
    %17 = arith.addf %15, %16 : vector<4x4xf32>
    %c0_12 = arith.constant 0 : index
    %c0_13 = arith.constant 0 : index
    %c0_14 = arith.constant 0 : index
    %18 = vector.load %arg4[%c0_12, %c0_13, %c0_14] : memref<1x4x4xf32, #tpu.memory_space<vmem>>, vector<1x4x4xf32>
    %19 = vector.shape_cast %18 : vector<1x4x4xf32> to vector<4x4xf32>
    %20 = vector.shape_cast %17 : vector<4x4xf32> to vector<1x4x4xf32>
    tpu.vector_store %arg4[%c0_12, %c0_13, %c0_14], %20 {strides = array<i32>} : memref<1x4x4xf32, #tpu.memory_space<vmem>>, vector<1x4x4xf32>,
    return
  }
  func.func @transform_0(%arg0: i32, %arg1: i32) -> (i32, i32, i32) {
    %c0_i32 = arith.constant 0 : i32
    %c0_i32_0 = arith.constant 0 : i32
    return %arg0, %c0_i32, %arg1 : i32, i32, i32
  }
  func.func @transform_1(%arg0: i32, %arg1: i32) -> (i32, i32, i32) {
    %c0_i32 = arith.constant 0 : i32
    %c0_i32_0 = arith.constant 0 : i32
    %c0_i32_1 = arith.constant 0 : i32
    return %arg0, %c0_i32, %c0_i32_0 : i32, i32, i32
  }
  func.func @transform_2(%arg0: i32, %arg1: i32) -> (i32, i32, i32) {
    %c0_i32 = arith.constant 0 : i32
    %c0_i32_0 = arith.constant 0 : i32
    %c0_i32_1 = arith.constant 0 : i32
    return %arg0, %c0_i32, %c0_i32_0 : i32, i32, i32
  }
}

</mosaic_0001>

<bundles_post_ra>
// kernel: tpu_custom_call.1
= control target key start
LH: loop header
LB: loop body
LE: loop exit
PB: predicated region body
PF: predicated region fallthrough
CT: control target
= control target key end

     0   :  { %8 = vsyncpa [#allocation3], 0  ;;  %s884_s0 = inlined_call_operand.hbm [shape: f32[2,4,256], index: 0, kind: input, shape index: {}]   ;;  %s885_s1 = inlined_call_operand.hbm [shape: f32[2,4,128], index: 1, kind: output, shape index: {0}]   ;;  %s886_s2 = inlined_call_operand.hbm [shape: f32[2,4,4], index: 2, kind: output, shape index: {1}]  }
   0x1   :  { %10 = vsyncpa [#allocation3 + $0x1], 0 }
   0x2   :  { %11 = vsyncpa [#allocation4], 0 }
   0x3   :  { %13 = vsyncpa [#allocation4 + $0x1], 0 }
   0x4   :  { %14 = vsyncpa [#allocation7], 0 }
   0x5   :  { %16 = vsyncpa [#allocation7 + $0x1], 0  ;;  %s676_s9 = smov 0   ;;  %s678_s10 = smov 0  }
   0x6   :  { %s680_s11 = smov 0   ;;  %s682_s12 = smov 0  }
   0x7   :  { %s684_s13 = smov 0   ;;  %s686_s14 = smov 0  }
   0x8 LB: > { %s424_s15 = sadd.s32 4294967295, %s655_s14   ;;  %s425_s16 = sadd.s32 4294967294, %s655_s14   ;;  %s655_s14 = sphi %s686_s14, %s22_s14   ;;  %s651_s13 = sphi %s684_s13, %s902_s13   ;;  %s647_s12 = sphi %s682_s12, %s901_s12   ;;  %s643_s11 = sphi %s680_s11, %s900_s11   ;;  %s639_s10 = sphi %s678_s10, %s899_s10   ;;  %s635_s9 = sphi %s676_s9, %s898_s9  }
   0x9   : > { %s34_s17 = sadd.s32 1, %s651_s13  ;;  %s43_s18 = sadd.s32 1, %s643_s11 }
   0xa   : > { %p36_p0 = scmp.ge.s32.totalorder %s34_s17, 2  ;;  %p50_p1 = scmp.ne.s32.totalorder %s643_s11, %s639_s10 }
   0xb   : > { %p51_p2 = scmp.eq.s32.totalorder %s655_s14, 0  ;;  %p56_p3 = scmp.ne.s32.totalorder %s639_s10, %s635_s9 }
   0xc   : > { %s904_s17 = smov (%p36_p0, %s34_s17), 0  ;;  %p57_p5 = scmp.eq.s32.totalorder %s424_s15, 0 }
   0xd   : > { %p717_p4 = por %p51_p2, %p50_p1  ;;  %s38_s20 = ssub.s32 %s651_s13, %s904_s17 }
   0xe   : > { %p80_p6 = scmp.eq.s32.totalorder %s424_s15, 1  ;;  %p41_p7 = scmp.eq.s32.totalorder %s38_s20, 0 }
   0xf   : > { %p723_p8 = por %p57_p5, %p56_p3  ;;  %p86_p10 = scmp.eq.s32.totalorder %s425_s16, 1 }
  0x10   : > { %p727_p9 = por %p80_p6, %p50_p1  ;;  %p459_p13 = scmp.lt.s32.totalorder %s655_s14, 2 }
  0x11   : > { %s732_s23 = scalar_select %p41_p7, %s643_s11, %s43_s18  }
  0x12   : > { %s890_s22 = scalar_select %p727_p9, 1, 0 }
  0x13   : > { %p734_p11 = por %p86_p10, %p56_p3  ;;  %s132_s25 = sand.u32 1, %s643_s11  }
  0x14   : > { %s428_s26 = sshll.u32 %s132_s25, 3  ;;  %s441_s27 = sshll.u32 %s651_s13, 7 }
  0x15   : > { %s891_s24 = scalar_select %p734_p11, 1, 0 }
  0x16   : > { %s745_s30 = scalar_lea.hbm %s884_s0, %s441_s27  ;;  %s136_s3 = scalar_lea.vmem [#allocation2], %s428_s26 }
  0x17   : > { %s146_s4 = sshll.u32 %s136_s3, 4  ;;  %p751_p0 = pnand %p459_p13, %p717_p4  ;;  %s747_s4 = int_to_ptr.vmem [resolvable:$true] %s146_s4 }
  0x18   : > { %s133_s6 = scalar_lea.sflag [#allocation3], %s132_s25  ;;  %s511_s7 = scalar_lea.hbm %s745_s30, 128 }
  0x19   : > { %p512_p3 = scmp.ne.s32.totalorder %s745_s30, %s511_s7  ;;  %p513_p5 = pneg %p751_p0 }
  0x1a   : > { %s516_s16 = scalar_lea.hbm %s884_s0, 256  ;;  %p517_p4 = scmp.lt.u32.totalorder %s745_s30, %s884_s0 }
  0x1b   : > { %p514_p6 = pnand %p513_p5, %p512_p3  ;;  %p518_p10 = scmp.lt.u32.totalorder %s516_s16, %s511_s7 }
  0x1c   : > { %p520_p12 = scmp.lt.u32.totalorder %s511_s7, %s745_s30 }
  0x1d   : > { %p515_p7 = pneg %p514_p6  ;;  %p519_p13 = por %p518_p10, %p517_p4 }
  0x1f   : > { %p521_p1 = por %p520_p12, %p519_p13 }
  0x21   : > { %p522_p2 = pnand %p521_p1, %p515_p7 }
  0x23   : > { %525 = shalt.err (!%p522_p2)
}
  0x24   : > { %s526_s20 = scalar_lea.vmem %s747_s4, 128  ;;  %s657_s25 = smov [#allocation2]  }
  0x25   : > { %p527_p3 = scmp.ne.s32.totalorder %s747_s4, %s526_s20  ;;  %s531_s26 = sshll.u32 %s657_s25, 4  ;;  %s532_s26 = int_to_ptr.vmem [resolvable:$false] %s531_s26 }
  0x26   : > { %s533_s27 = scalar_lea.vmem %s532_s26, 256  ;;  %p534_p9 = scmp.lt.s32.totalorder %s747_s4, %s532_s26 }
  0x27   : > { %p529_p6 = pnand %p527_p3, %p513_p5  ;;  %p535_p4 = scmp.lt.s32.totalorder %s533_s27, %s526_s20 }
  0x29   : > { %p530_p11 = pneg %p529_p6  ;;  %p536_p10 = por %p535_p4, %p534_p9 }
  0x2b   : > { %p537_p12 = pnand %p536_p10, %p530_p11 }
  0x2d   : > { %540 = shalt.err (!%p537_p12)
}
  0x2e   : > { %451 = dma.hbm_to_vmem [thread:$0]  (!%p751_p0), %s745_s30, 128, %s747_s4, %s133_s6  }
  0x2f   : > { %p893_p1 = scmp.lt.s32.totalorder %s655_s14, 3  ;;  %p894_p2 = scmp.ge.s32.totalorder %s655_s14, 1 }
  0x31   : > { %p152_p5 = pnand %p894_p2, %p893_p1 }
  0x32   : > { %s787_s28 = sand.u32 (!%p152_p5), 1, %s639_s10  }
  0x33   : > { %155 = sbr.rel (%p152_p5) target bundleno = 294 (0x126), region = 24  ;;  %s432_s29 = sshll.u32 (!%p152_p5), %s787_s28, 3 }
  0x34   : > { %s158_s3 = scalar_lea.sflag (!%p152_p5), [#allocation3], %s787_s28  ;;  %s161_s7 = scalar_lea.vmem (!%p152_p5), [#allocation2], %s432_s29 }
  0x3a   : > { %622 = dma.done.wait (%p723_p8), %s158_s3, 128  }
  0x3b   : > { %624 = vsyncadd (%p723_p8), %s158_s3, 4294967168  ;;  %s433_s30 = sshll.u32 %s787_s28, 2  ;;  %vm193_vm0 = vcmask 27648   ;;  %v658_v0 = vmov 0.0   ;;  %v195_v1 = vld [vmem:[%s161_s7] sm:$0xff]  ;;  %s437_s21 = sshll.u32 %s647_s12, 6 }
  0x3c   : > { %s179_s4 = scalar_lea.vmem [#allocation5], %s433_s30  ;;  %s796_s5 = scalar_lea.vmem [#allocation6], %s433_s30  ;;  %v197_v2 = vrot.slane %v195_v1, 4  ;;  %v204_v3 = vcombine.high %v195_v1, %v195_v1 }
  0x3d   : > { %192 = vst [vmem:[%s179_s4] sm:$0xf] %v658_v0  ;;  %194 = vst.msk [vmem:[%s796_s5] sm:$0xf] %vm193_vm0, %v658_v0  ;;  %s298_s6 = sshll.u32 %s179_s4, 4  ;;  %s806_s16 = scalar_lea.hbm %s885_s1, %s437_s21  ;;  %s299_s6 = int_to_ptr.vmem [resolvable:$true] %s298_s6 }
  0x3e   : > { %v199_v5 = vadd.f32 %v197_v2, %v195_v1  ;;  %206 = vmatprep.subr.mxu0 %v204_v3  ;;  %270 = vmatprep.mubr.f32.mxu0 %v204_v3  ;;  %s280_s18 = scalar_lea.sflag [#allocation4], %s787_s28  ;;  %s541_s19 = scalar_lea.vmem %s299_s6, 64 }
  0x3f   : > { %207 = vmatpush1.xpose.msra.mxu0 %v195_v1  ;;  %p542_p8 = scmp.ne.s32.totalorder %s299_s6, %s541_s19  ;;  %p895_p9 = scmp.ne.s32.totalorder %s890_s22, 0 }
  0x40   : > { %s659_s20 = smov [#allocation5]  }
  0x41   : > { %p543_p11 = pnand %p542_p8, %p895_p9  ;;  %s545_s25 = sshll.u32 %s659_s20, 4  ;;  %s546_s25 = int_to_ptr.vmem [resolvable:$false] %s545_s25 }
  0x42   : > { %271 = vmatmul.mubr.f32.vlgmr.msra.gmra.mrb[0].mxu0 %v195_v1  ;;  %s547_s26 = scalar_lea.vmem %s546_s25, 128  ;;  %p548_p7 = scmp.lt.s32.totalorder %s299_s6, %s546_s25 }
  0x43   : > { %p544_p0 = pneg %p543_p11  ;;  %p549_p13 = scmp.lt.s32.totalorder %s547_s26, %s541_s19 }
  0x44   : > { %v200_v4 = vld [vmem:[%s179_s4] sm:$0xf] }
  0x45   : > { %v201_v6 = vadd.f32 %v200_v4, %v199_v5  ;;  %p550_p3 = por %p549_p13, %p548_p7 }
  0x47   : > { %202 = vst [vmem:[%s179_s4] sm:$0xf] %v201_v6  ;;  %p551_p6 = pnand %p550_p3, %p544_p0 }
  0x49   : > { %554 = shalt.err (!%p551_p6)
}
  0x4a   : > { %s555_s27 = scalar_lea.hbm %s806_s16, 64  ;;  %s559_s7 = scalar_lea.hbm %s885_s1, 128 }
  0x4b   : > { %p556_p4 = scmp.ne.s32.totalorder %s806_s16, %s555_s27  ;;  %p560_p1 = scmp.lt.u32.totalorder %s806_s16, %s885_s1 }
  0x4c   : > { %p561_p2 = scmp.lt.u32.totalorder %s559_s7, %s555_s27  ;;  %p563_p8 = scmp.lt.u32.totalorder %s555_s27, %s806_s16 }
  0x4d   : > { %p557_p10 = pnand %p556_p4, %p895_p9 }
  0x4e   : > { %p562_p5 = por %p561_p2, %p560_p1 }
  0x4f   : > { %p558_p12 = pneg %p557_p10 }
  0x50   : > { %p564_p11 = por %p563_p8, %p562_p5 }
  0x52   : > { %p565_p0 = pnand %p564_p11, %p558_p12 }
  0x54   : > { %568 = shalt.err (!%p565_p0)
}
  0x55   : > { %444 = dma.vmem_to_hbm [thread:$0]  (%p895_p9), %s299_s6, 64, %s806_s16, %s280_s18   ;;  %v203_v7 = vld [vmem:[%s796_s5] sm:$0xf] }
  0x56   : > { %s311_s8 = sshll.u32 %s796_s5, 4  ;;  %s833_s20 = scalar_lea.hbm %s886_s2, %s437_s21  ;;  %s835_s8 = int_to_ptr.vmem [resolvable:$true] %s311_s8 }
  0x57   : > { %s285_s25 = scalar_lea.sflag [#allocation7], %s787_s28  ;;  %s569_s6 = scalar_lea.vmem %s835_s8, 64 }
  0x58   : > { %p570_p7 = scmp.ne.s32.totalorder %s835_s8, %s569_s6  ;;  %s660_s16 = smov [#allocation6]  }
  0x59   : > { %s573_s12 = sshll.u32 %s660_s16, 4  ;;  %s574_s12 = int_to_ptr.vmem [resolvable:$false] %s573_s12 }
  0x5a   : > { %p571_p13 = pnand %p570_p7, %p895_p9  ;;  %s575_s18 = scalar_lea.vmem %s574_s12, 128 }
  0x5b   : > { %p576_p6 = scmp.lt.s32.totalorder %s835_s8, %s574_s12  ;;  %p577_p4 = scmp.lt.s32.totalorder %s575_s18, %s569_s6 }
  0x5c   : > { %p572_p3 = pneg %p571_p13 }
  0x5d   : > { %p578_p10 = por %p577_p4, %p576_p6 }
  0x5f   : > { %p579_p12 = pnand %p578_p10, %p572_p3 }
 0x115   : > { %v272_v8 = vpop.f32.mrb[0].mxu0 }
 0x116   : > { %v276_v9 = vadd.f32 %v272_v8, %v203_v7  ;;  %v274_v10 = vpop.f32.mrb[1].mxu0 }
 0x118   : > { %278 = vst.msk [vmem:[%s796_s5] sm:$0xf] %vm193_vm0, %v276_v9 }
 0x119   : > { %582 = shalt.err (!%p579_p12)
}
 0x11a   : > { %s583_s28 = scalar_lea.hbm %s833_s20, 64  ;;  %s587_s26 = scalar_lea.hbm %s886_s2, 128 }
 0x11b   : > { %p584_p1 = scmp.ne.s32.totalorder %s833_s20, %s583_s28  ;;  %p588_p8 = scmp.lt.u32.totalorder %s833_s20, %s886_s2 }
 0x11c   : > { %p589_p11 = scmp.lt.u32.totalorder %s587_s26, %s583_s28  ;;  %p591_p7 = scmp.lt.u32.totalorder %s583_s28, %s833_s20 }
 0x11d   : > { %p585_p2 = pnand %p584_p1, %p895_p9 }
 0x11e   : > { %p590_p0 = por %p589_p11, %p588_p8 }
 0x11f   : > { %p586_p5 = pneg %p585_p2 }
 0x120   : > { %p592_p13 = por %p591_p7, %p590_p0 }
 0x122   : > { %p593_p3 = pnand %p592_p13, %p586_p5 }
 0x124   : > { %596 = shalt.err (!%p593_p3)
}
 0x125   : > { %445 = dma.vmem_to_hbm [thread:$0]  (%p895_p9), %s835_s8, 64, %s833_s20, %s285_s25  }
 0x126 PF: > { %s323_s3 = sand.u32 1, %s635_s9   ;;  %p896_p6 = scmp.ne.s32.totalorder %s891_s24, 0 }
 0x127   : > { %p897_p4 = scmp.ge.s32.totalorder %s655_s14, 2  ;;  %s324_s7 = scalar_lea.sflag [#allocation4], %s323_s3 }
 0x129   : > { %p453_p10 = pnand %p897_p4, %p896_p6 }
 0x12b   : > { %626 = dma.done.wait (!%p453_p10), %s324_s7, 64  }
 0x12c   : > { %628 = vsyncadd (!%p453_p10), %s324_s7, 4294967232  ;;  %s333_s30 = scalar_lea.sflag [#allocation7], %s323_s3 }
 0x12d   : > { %630 = dma.done.wait (!%p453_p10), %s333_s30, 64  }
 0x12e   : > { %632 = vsyncadd (!%p453_p10), %s333_s30, 4294967232  ;;  %s22_s14 = sadd.s32 1, %s655_s14   ;;  %s898_s9 = smov %s639_s10 }
 0x12f   : > { %p19_p12 = scmp.ge.s32.totalorder %s22_s14, 4   ;;  %s899_s10 = smov %s643_s11 }
 0x130   : > { %s900_s11 = smov %s732_s23  ;;  %s901_s12 = smov %s651_s13 }
 0x131   : > { %s902_s13 = smov %s904_s17  ;;  %21 = sbr.rel (!%p19_p12) target bundleno = 8 (0x8), region = 90 }
 0x138   :  { %338 = vsyncpa [#allocation3], 1 }
 0x139   :  { %340 = vsyncpa [#allocation3 + $0x1], 1 }
 0x13a   :  { %341 = vsyncpa [#allocation4], 1 }
 0x13b   :  { %343 = vsyncpa [#allocation4 + $0x1], 1 }
 0x13c   :  { %344 = vsyncpa [#allocation7], 1 }
 0x13d   :  { %346 = vsyncpa [#allocation7 + $0x1], 1 }

</bundles_post_ra>
